<compile_context>
chip_gen: v5e
topology: v5e:2x2
jax: 0.10.0
libtpu: 0.0.40
codegen_flags: <defaults>
</compile_context>

<pallas_src>
import jax
import jax.numpy as jnp
from jax.experimental import pallas as pl
from jax.experimental.pallas import tpu as pltpu


def _round_up(x, m):
    return ((x + m - 1) // m) * m


def _patch_embed_kernel(x_ref, w_ref, b_ref, o_ref):
    # x_ref: (tm, g*P)   folded patch rows (streamed tile, bf16)
    # w_ref: (g*P, g*D)  block-diagonal projection weight (resident, bf16)
    # b_ref: (1, g*D)    tiled bias (resident, bf16)
    # o_ref: (tm, g*D)   output tile (bf16)
    acc = jnp.dot(x_ref[...], w_ref[...], preferred_element_type=jnp.float32)
    o_ref[...] = (acc + b_ref[...].astype(jnp.float32)).astype(o_ref.dtype)


def make_patch_embed(weight, bias, patch_size, *,
                     compute_dtype=jnp.bfloat16,
                     vmem_tile_budget_bytes=20 * 1024 * 1024):
    """Builds a jitted PatchEmbed forward for fixed (weight, bias).

    weight: (D, P)  torch nn.Linear weight layout
    bias:   (D,)
    Returns fwd(x) with x: (B, C, L) -> (B, C, num_patches, D) in compute_dtype.
    """
    D, P = weight.shape
    assert P == patch_size

    # Lane-density fold factor: pack g patches per row so K == 128 exactly.
    g = 128 // P if (P < 128 and 128 % P == 0) else 1
    Kf = g * P            # folded input width  (128 when P divides 128)
    Nf = g * D            # folded output width (lane-dense)

    # Block-diagonal weight / tiled bias -- built once, cached on device.
    w_t = weight.T                                            # (P, D), f32
    if g > 1:
        eye = jnp.eye(g, dtype=w_t.dtype)
        w_k = jnp.einsum("ij,pd->ipjd", eye, w_t).reshape(Kf, Nf)
        b_k = jnp.tile(bias, g).reshape(1, Nf)
    else:
        w_k = w_t
        b_k = bias.reshape(1, Nf)
    w_k = jax.device_put(w_k.astype(compute_dtype))
    b_k = jax.device_put(b_k.astype(compute_dtype))
    itemsize = jnp.dtype(compute_dtype).itemsize

    @jax.jit
    def fwd(x):
        B, C, L = x.shape
        num_patches = (L - P) // P + 1

        # unfold(-1, P, P): non-overlapping patches (free reshape).
        x_unf = x[..., : num_patches * P].reshape(B, C, num_patches, P)
        x_flat = x_unf.reshape(B * C * num_patches, P).astype(compute_dtype)
        M = x_flat.shape[0]

        # Pad only to a multiple of g (<= g-1 rows; zero in the common case).
        M_pad = _round_up(M, g)
        if M_pad != M:
            x_flat = jnp.pad(x_flat, ((0, M_pad - M), (0, 0)))
        Mg = M_pad // g
        x_fold = x_flat.reshape(Mg, Kf)

        # Row-tile size from VMEM budget; large cap to amortize per-step
        # overhead, but keep >= ~8 grid blocks when there is enough work.
        bytes_per_row = itemsize * (Kf + Nf)
        tm = vmem_tile_budget_bytes // (2 * bytes_per_row)
        tm = max(8, min(8192, tm))
        tm = min(tm, max(8, _round_up(-(-Mg // 8), 8)))
        tm = _round_up(tm, 8)

        grid = (pl.cdiv(Mg, tm),)   # partial last block handled by Pallas

        # Right-sized VMEM limit: double-buffered in/out tiles + resident
        # weight/bias + slack for compiler scratch.
        vmem_need = (2 * tm * (Kf + Nf) + Kf * Nf + Nf) * itemsize
        vmem_limit = min(64 * 1024 * 1024,
                         max(16 * 1024 * 1024, int(vmem_need) + 4 * 1024 * 1024))

        out_fold = pl.pallas_call(
            _patch_embed_kernel,
            out_shape=jax.ShapeDtypeStruct((Mg, Nf), compute_dtype),
            grid_spec=pltpu.PrefetchScalarGridSpec(
                num_scalar_prefetch=0,
                grid=grid,
                in_specs=[
                    pl.BlockSpec((tm, Kf), lambda i: (i, 0)),   # streamed rows
                    pl.BlockSpec((Kf, Nf), lambda i: (0, 0)),   # weight resident
                    pl.BlockSpec((1, Nf), lambda i: (0, 0)),    # bias resident
                ],
                out_specs=pl.BlockSpec((tm, Nf), lambda i: (i, 0)),
            ),
            compiler_params=pltpu.CompilerParams(
                dimension_semantics=("parallel",),
                vmem_limit_bytes=vmem_limit,
            ),
            cost_estimate=pl.CostEstimate(
                flops=2 * M * P * D,
                bytes_accessed=itemsize * (M_pad * Kf // g * g + Kf * Nf + M_pad * D),
                transcendentals=0,
            ),
        )(x_fold, w_k, b_k)

        # Each folded row holds g consecutive patch embeddings (free reshape).
        out_flat = out_fold.reshape(M_pad, D)
        if M_pad != M:
            out_flat = out_flat[:M]
        return out_flat.reshape(B, C, num_patches, D)

    return fwd


if __name__ == "__main__":
    # Small, module-consistent shapes: seq_length=64, patch_size=16 -> 4 patches,
    # in_channels=1, embed_dim=32, batch=2.
    B, C, L = 2, 1, 64
    patch_size = 16
    embed_dim = 32

    key = jax.random.PRNGKey(0)
    kx, kw, kb = jax.random.split(key, 3)

    x = jax.random.normal(kx, (B, C, L), dtype=jnp.float32)
    # Deterministic synthetic Linear(P, D) params (torch layout: (D, P) weight).
    bound = 1.0 / (patch_size ** 0.5)
    weight = jax.random.uniform(kw, (embed_dim, patch_size),
                                minval=-bound, maxval=bound, dtype=jnp.float32)
    bias = jax.random.uniform(kb, (embed_dim,),
                              minval=-bound, maxval=bound, dtype=jnp.float32)

    fwd = make_patch_embed(weight, bias, patch_size)
    out = fwd(x)
    out = jax.block_until_ready(out)

    # Reference (plain JAX, f32) check of the exact PyTorch forward semantics.
    num_patches = (L - patch_size) // patch_size + 1
    x_unf = x[..., : num_patches * patch_size].reshape(B, C, num_patches, patch_size)
    ref = jnp.einsum("bcnp,dp->bcnd", x_unf, weight) + bias

    assert out.shape == (B, C, num_patches, embed_dim)
    assert out.dtype == jnp.bfloat16
    # bf16 operands/output, f32 accumulation -> bf16-level tolerance vs f32 ref.
    assert jnp.allclose(out.astype(jnp.float32), ref, atol=5e-2, rtol=5e-2)

    print("KERNEL_OK")
</pallas_src>

<mosaic_0001>
module attributes {stable_mosaic.version = 11 : i64} {
  func.func @_patch_embed_kernel(%arg0: i32, %arg1: memref<8x128xbf16, #tpu.memory_space<vmem>>, %arg2: memref<128x256xbf16, #tpu.memory_space<vmem>>, %arg3: memref<1x256xbf16, #tpu.memory_space<vmem>>, %arg4: memref<8x256xbf16, #tpu.memory_space<vmem>>) attributes {dimension_semantics = [#tpu.dimension_semantics<parallel>], iteration_bounds = array<i64: 1>, scalar_prefetch = 0 : i64, scratch_operands = 0 : i64, tpu.core_type = #tpu.core_type<tc>, window_params = [{transform_indices = @transform_0, window_bounds = array<i64: 8, 128>}, {pipeline_mode = #tpu.pipeline_mode<synchronous>, transform_indices = @transform_1, window_bounds = array<i64: 128, 256>}, {pipeline_mode = #tpu.pipeline_mode<synchronous>, transform_indices = @transform_2, window_bounds = array<i64: 1, 256>}, {transform_indices = @transform_3, window_bounds = array<i64: 8, 256>}]} {
    %c0 = arith.constant 0 : index
    %c0_0 = arith.constant 0 : index
    %0 = vector.load %arg1[%c0, %c0_0] : memref<8x128xbf16, #tpu.memory_space<vmem>>, vector<8x128xbf16>
    %c0_1 = arith.constant 0 : index
    %c0_2 = arith.constant 0 : index
    %1 = vector.load %arg2[%c0_1, %c0_2] : memref<128x256xbf16, #tpu.memory_space<vmem>>, vector<128x256xbf16>
    %cst = arith.constant dense<0.000000e+00> : vector<8x256xf32>
    %2 = tpu.matmul %0, %1, %cst {dimension_numbers = #tpu.dot_dimension_numbers<[1], [0], [0], [1], [0, 0, 1, 1], [], []>} : vector<8x128xbf16>, vector<128x256xbf16>, vector<8x256xf32> -> vector<8x256xf32>
    %c0_3 = arith.constant 0 : index
    %c0_4 = arith.constant 0 : index
    %3 = vector.load %arg3[%c0_3, %c0_4] : memref<1x256xbf16, #tpu.memory_space<vmem>>, vector<1x256xbf16>
    %4 = arith.extf %3 : vector<1x256xbf16> to vector<1x256xf32>
    %5 = vector.broadcast %4 : vector<1x256xf32> to vector<8x256xf32>
    %6 = arith.addf %2, %5 : vector<8x256xf32>
    %7 = arith.truncf %6 : vector<8x256xf32> to vector<8x256xbf16>
    %c0_5 = arith.constant 0 : index
    %c0_6 = arith.constant 0 : index
    %8 = vector.load %arg4[%c0_5, %c0_6] : memref<8x256xbf16, #tpu.memory_space<vmem>>, vector<8x256xbf16>
    tpu.vector_store %arg4[%c0_5, %c0_6], %7 {strides = array<i32>} : memref<8x256xbf16, #tpu.memory_space<vmem>>, vector<8x256xbf16>,
    return
  }
  func.func @transform_0(%arg0: i32) -> (i32, i32) {
    %c0_i32 = arith.constant 0 : i32
    %c0_i32_0 = arith.constant 0 : i32
    return %arg0, %c0_i32 : i32, i32
  }
  func.func @transform_1(%arg0: i32) -> (i32, i32) {
    %c0_i32 = arith.constant 0 : i32
    %c0_i32_0 = arith.constant 0 : i32
    %c0_i32_1 = arith.constant 0 : i32
    return %c0_i32, %c0_i32_0 : i32, i32
  }
  func.func @transform_2(%arg0: i32) -> (i32, i32) {
    %c0_i32 = arith.constant 0 : i32
    %c0_i32_0 = arith.constant 0 : i32
    %c0_i32_1 = arith.constant 0 : i32
    return %c0_i32, %c0_i32_0 : i32, i32
  }
  func.func @transform_3(%arg0: i32) -> (i32, i32) {
    %c0_i32 = arith.constant 0 : i32
    %c0_i32_0 = arith.constant 0 : i32
    return %arg0, %c0_i32 : i32, i32
  }
}

</mosaic_0001>

<bundles_post_ra>
// kernel: fwd.1
= control target key start
LH: loop header
LB: loop body
LE: loop exit
PB: predicated region body
PF: predicated region fallthrough
CT: control target
= control target key end

     0   :  { %8 = vsyncpa [#allocation3], 0  ;;  %s356_s15 = smov [#allocation2]   ;;  %s357_s17 = smov 128   ;;  %s400_s0 = inlined_call_operand.vmem [shape: bf16[1,128], index: 0, kind: input, shape index: {}]   ;;  %s401_s1 = inlined_call_operand.hbm [shape: bf16[128,256], index: 1, kind: input, shape index: {}]   ;;  %s402_s2 = inlined_call_operand.vmem [shape: bf16[1,256], index: 2, kind: input, shape index: {}]   ;;  %s403_s3 = inlined_call_operand.vmem [shape: bf16[1,256], index: 3, kind: output, shape index: {}]  }
   0x1   :  { %s15_s14 = sshll.u32 %s401_s1, 4  ;;  %s17_s16 = sshll.u32 %s356_s15, 4  ;;  %s16_s14 = int_to_ptr.hbm [resolvable:$true] %s15_s14  ;;  %s18_s16 = int_to_ptr.vmem [resolvable:$true] %s17_s16 }
   0x2   :  { %s358_s18 = smov 8  }
   0x3   :  { %23 = dma.hbm_to_vmem [thread:$0]  %s16_s14, 2048, %s18_s16, [#allocation3], %s357_s17, %s357_s17, %s358_s18  }
   0x4   :  { %354 = dma.done.wait [#allocation3], 2048  }
   0x5   :  { %355 = vsyncadd [#allocation3], 4294965248  ;;  %v305_v0 = vld [vmem:[#allocation2 + $0x70] sm:$0xf]  ;;  %v326_v1 = vld [vmem:[#allocation2 + $0x74] sm:$0xf0] }
   0x6   :  { %v325_v2 = vld [vmem:[#allocation2 + $0x74] sm:$0xf]  ;;  %v306_v3 = vor.u32 %v326_v1, %v305_v0  ;;  %v307_v4 = vld [vmem:[#allocation2 + $0x78] sm:$0xf0]  ;;  %v297_v5 = vld [vmem:[#allocation2 + $0x60] sm:$0xf] }
   0x7   :  { %v324_v6 = vld [vmem:[#allocation2 + $0x64] sm:$0xf0]  ;;  %v310_v7 = vor.u32 %v325_v2, %v307_v4  ;;  %v323_v8 = vld [vmem:[#allocation2 + $0x64] sm:$0xf]  ;;  %v299_v9 = vld [vmem:[#allocation2 + $0x68] sm:$0xf0] }
   0x8   :  { %152 = vmatpush.bf16.msra.mxu0 %v306_v3  ;;  %v298_v10 = vor.u32 %v324_v6, %v297_v5  ;;  %v302_v11 = vor.u32 %v323_v8, %v299_v9  ;;  %v289_v12 = vld [vmem:[#allocation2 + $0x50] sm:$0xf]  ;;  %v322_v13 = vld [vmem:[#allocation2 + $0x54] sm:$0xf0]  ;;  %v321_v14 = vld [vmem:[#allocation2 + $0x54] sm:$0xf] }
   0x9   :  { %165 = vmatpush.bf16.msra.mxu1 %v310_v7  ;;  %v291_v15 = vld [vmem:[#allocation2 + $0x58] sm:$0xf0]  ;;  %v290_v16 = vor.u32 %v322_v13, %v289_v12  ;;  %v281_v18 = vld [vmem:[#allocation2 + $0x40] sm:$0xf]  ;;  %v320_v19 = vld [vmem:[#allocation2 + $0x44] sm:$0xf0] }
   0xa   :  { %v294_v17 = vor.u32 %v321_v14, %v291_v15  ;;  %v319_v20 = vld [vmem:[#allocation2 + $0x44] sm:$0xf]  ;;  %v283_v21 = vld [vmem:[#allocation2 + $0x48] sm:$0xf0]  ;;  %v30_v22 = vld [vmem:[%s400_s0] sm:$0x1]  ;;  %v282_v23 = vor.u32 %v320_v19, %v281_v18 }
   0xb   :  { %v273_v24 = vld [vmem:[#allocation2 + $0x30] sm:$0xf]  ;;  %v31_v25 = vld [vmem:[%s400_s0 + $0x1] sm:$0x1]  ;;  %v32_v26 = vld [vmem:[%s400_s0 + $0x2] sm:$0x1]  ;;  %v286_v27 = vor.u32 %v319_v20, %v283_v21 }
   0xc   :  { %153 = vmatpush.bf16.msra.mxu0 %v298_v10  ;;  %v318_v28 = vld [vmem:[#allocation2 + $0x34] sm:$0xf0]  ;;  %60 = vst [vmem:[#allocation1] ss:$9 sm:$0xff] %v30_v22  ;;  %v317_v30 = vld [vmem:[#allocation2 + $0x34] sm:$0xf] }
   0xd   :  { %166 = vmatpush.bf16.msra.mxu1 %v302_v11  ;;  %v33_v29 = vld [vmem:[%s400_s0 + $0x3] sm:$0x1]  ;;  %v275_v31 = vld [vmem:[#allocation2 + $0x38] sm:$0xf0]  ;;  %63 = vst [vmem:[#allocation1 + $0x1] ss:$9 sm:$0xff] %v31_v25  ;;  %v274_v32 = vor.u32 %v318_v28, %v273_v24 }
   0xe   :  { %66 = vst [vmem:[#allocation1 + $0x2] ss:$9 sm:$0xff] %v32_v26  ;;  %v278_v33 = vor.u32 %v317_v30, %v275_v31  ;;  %v265_v34 = vld [vmem:[#allocation2 + $0x20] sm:$0xf]  ;;  %v316_v35 = vld [vmem:[#allocation2 + $0x24] sm:$0xf0] }
   0xf   :  { %69 = vst [vmem:[#allocation1 + $0x3] ss:$9 sm:$0xff] %v33_v29  ;;  %v315_v36 = vld [vmem:[#allocation2 + $0x24] sm:$0xf]  ;;  %v267_v37 = vld [vmem:[#allocation2 + $0x28] sm:$0xf0]  ;;  %v266_v38 = vor.u32 %v316_v35, %v265_v34 }
  0x10   :  { %154 = vmatpush.bf16.msra.mxu0 %v290_v16  ;;  %v270_v39 = vor.u32 %v315_v36, %v267_v37  ;;  %v257_v40 = vld [vmem:[#allocation2 + $0x10] sm:$0xf]  ;;  %v314_v41 = vld [vmem:[#allocation2 + $0x14] sm:$0xf0]  ;;  %v313_v42 = vld [vmem:[#allocation2 + $0x14] sm:$0xf] }
  0x11   :  { %167 = vmatpush.bf16.msra.mxu1 %v294_v17  ;;  %v259_v43 = vld [vmem:[#allocation2 + $0x18] sm:$0xf0]  ;;  %v258_v44 = vor.u32 %v314_v41, %v257_v40  ;;  %v249_v46 = vld [vmem:[#allocation2] sm:$0xf]  ;;  %v312_v47 = vld [vmem:[#allocation2 + $0x4] sm:$0xf0] }
  0x12   :  { %v262_v45 = vor.u32 %v313_v42, %v259_v43  ;;  %v311_v48 = vld [vmem:[#allocation2 + $0x4] sm:$0xf]  ;;  %v251_v49 = vld [vmem:[#allocation2 + $0x8] sm:$0xf0]  ;;  %v250_v50 = vor.u32 %v312_v47, %v249_v46  ;;  %v50_v53 = vld [vmem:[%s402_s2] sm:$0x3] }
  0x13   :  { %v254_v51 = vor.u32 %v311_v48, %v251_v49  ;;  %v51_v54 = vunpack.c.l.bf16 %v50_v53  ;;  %vm181_vm0 = vcmask 1040384  }
  0x14   :  { %155 = vmatpush.bf16.msra.mxu0 %v282_v23 }
  0x15   :  { %168 = vmatpush.bf16.msra.mxu1 %v286_v27  ;;  %v53_v55 = vperm.slane %v51_v54, 0  ;;  %v54_v56 = vperm.slane %v51_v54, 2 }
  0x16   :  { %v70_v52 = vld [vmem:[#allocation1] sm:$0xff] }
  0x17   :  { %v57_v57 = vperm.slane %v53_v55, 0  ;;  %v58_v58 = vperm.slane %v54_v56, 0 }
  0x18   :  { %156 = vmatpush.bf16.msra.mxu0 %v274_v32 }
  0x19   :  { %169 = vmatpush.bf16.msra.mxu1 %v278_v33 }
  0x1c   :  { %157 = vmatpush.bf16.msra.mxu0 %v266_v38 }
  0x1d   :  { %170 = vmatpush.bf16.msra.mxu1 %v270_v39 }
  0x20   :  { %158 = vmatpush.bf16.msra.mxu0 %v258_v44 }
  0x21   :  { %171 = vmatpush.bf16.msra.mxu1 %v262_v45 }
  0x24   :  { %159 = vmatpush.bf16.msra.mxu0 %v250_v50 }
  0x25   :  { %172 = vmatpush.bf16.msra.mxu1 %v254_v51 }
  0x27   :  { %160 = vmatmul.bf16.vlgmr.msra.gmra.mxu0 %v70_v52 }
  0x28   :  { %173 = vmatmul.bf16.vlgmr.msra.gmra.mxu1 %v70_v52 }
  0xa4   :  { %v161_v59 = vpop.f32.mrf.mxu0 }
  0xa5   :  { %v162_v60 = vadd.f32 %v161_v59, %v57_v57  ;;  %v174_v61 = vpop.f32.mrf.mxu1 }
  0xa6   :  { %v175_v62 = vadd.f32 %v174_v61, %v58_v58 }
  0xa8   :  { %v178_v63 = vpack.c.bf16 %v175_v62, %v162_v60 }
  0xaa   :  { %v180_v0 = vrot.slane %v178_v63, 3 }
  0xac   :  { %v184_v1 = vsel %vm181_vm0, %v178_v63, %v180_v0  ;;  %v163_v2 = vpop.f32.mrf.mxu0 }
  0xad   :  { %201 = vst [vmem:[#allocation4] sm:$0x3] %v184_v1  ;;  %v176_v3 = vpop.f32.mrf.mxu1 }
  0xb4   :  { %v223_v4 = vld [vmem:[#allocation4] sm:$0x3] }
  0xb5   :  { %224 = vst [vmem:[%s403_s3] sm:$0x3] %v223_v4 }
  0xb6   :  { %242 = vsyncpa [#allocation3], 1 }

</bundles_post_ra>
